<compile_context>
chip_gen: v7x
topology: tpu7x:2x2x1
jax: 0.10.0
libtpu: 0.0.40
codegen_flags: <defaults>
</compile_context>

<pallas_src>
import functools
from collections import deque

import numpy as np
import jax
import jax.numpy as jnp
from jax.experimental import pallas as pl
from jax.experimental.pallas import tpu as pltpu

VOCAB_SIZE = 16       # vocab_size
EMBED_DIM = 32        # embedding_dim
MAX_DEPTH = 4         # deepest tree-position path in the example tree
MAX_NODE_SIZE = 0     # 0 -> no truncation (module default)
EPS = 1e-6


# -----------------------------------------------------------------------------
# Host-side glue: synthetic tree + BFS traversal (pure Python object walk).
# -----------------------------------------------------------------------------
class Node:
    def __init__(self, kind, children=()):
        self.kind = kind
        self._children = list(children)

    def get_children(self):
        return self._children


kinds = {k: i for i, k in enumerate(
    ["module", "func", "if", "for", "call", "name", "const", "binop"])}


def breadth_traversal(root, max_node_size=0):
    kind_list, position_list = [], []
    queue = deque([(root, [1])])
    while queue:
        if 0 < max_node_size <= len(kind_list):
            break
        node, position = queue.popleft()
        kind_list.append(kinds[node.kind])
        position_list.append(position)
        for index, child in enumerate(node.get_children()):
            queue.append((child, position + [index + 1]))
    return kind_list, position_list


def pad_positions(position_list, max_depth):
    S = len(position_list)
    paths = np.zeros((S, max_depth), dtype=np.int32)
    mask = np.zeros((S, max_depth), dtype=np.int32)
    for i, pos in enumerate(position_list):
        L = min(len(pos), max_depth)
        paths[i, :L] = pos[:L]
        mask[i, :L] = 1
    return jnp.asarray(paths), jnp.asarray(mask)


# -----------------------------------------------------------------------------
# Positional-encoding basis, per depth slot: [ sin(path_d * inv_freq) |
# cos(path_d * inv_freq) ], masked for padded depths.  Summing over depth and
# L2-normalizing reproduces the module's positional vector.
# TODO(synk): TreePositionalEncoding / normalize_position_encoding bodies are
# not given in the reference source; implemented as a sinusoidal encoding of
# the tree-position path (summed over depth) followed by per-node L2 norm.
# -----------------------------------------------------------------------------
def make_position_basis(paths, mask, d_model):
    half = d_model // 2
    j = jnp.arange(half, dtype=jnp.float32)
    inv_freq = jnp.exp(-(2.0 * j) * (jnp.log(10000.0) / d_model))           # (half,)
    ang = paths.astype(jnp.float32)[:, :, None] * inv_freq[None, None, :]   # (S,MD,half)
    m = mask.astype(jnp.float32)[:, :, None]
    return jnp.concatenate([jnp.sin(ang) * m, jnp.cos(ang) * m], axis=-1)   # (S,MD,D)


# -----------------------------------------------------------------------------
# Pallas kernel: one grid step per tile of `tile_rows` packed rows
# (G = 128 // D tokens per row; everything lane-dense).
# -----------------------------------------------------------------------------
def tree_embedding_kernel(ids_ref, basis_ref, table_ref, gsum_ref, out_ref, *,
                          max_depth, vpad, eps):
    rows, lanes = out_ref.shape                                             # (tile_rows, 128)

    # nn.Embedding lookup: lane-dense one-hot (K = 128) @ block-diagonal,
    # VMEM-resident table on the (otherwise idle) MXU.
    lane = jax.lax.broadcasted_iota(jnp.int32, (rows, lanes), 1)
    onehot = (ids_ref[...] == lane % vpad).astype(jnp.float32)              # (rows, 128)
    emb = jnp.dot(onehot, table_ref[...],
                  preferred_element_type=jnp.float32)                       # (rows, 128)

    # Depth reduction over the packed sin/cos basis: each depth slot is a
    # full, vreg-aligned 128-lane slice -> plain VPU adds, no lane movement.
    pe = basis_ref[:, 0:lanes]
    for d in range(1, max_depth):
        pe = pe + basis_ref[:, d * lanes:(d + 1) * lanes]                   # (rows, 128)

    # Per-token L2 norm: 32-lane group sum-of-squares via a 0/1 matmul on the
    # MXU (already broadcast to every lane of the token's span), rsqrt on EUP.
    sq = jnp.dot(pe * pe, gsum_ref[...], preferred_element_type=jnp.float32)
    out_ref[...] = emb + pe * jax.lax.rsqrt(sq + eps)                       # dense 128-lane store


def tree_embedding_reference(node_ids, basis3, emb_table):
    pe = basis3.sum(axis=1)                                                 # (S, D)
    pe = pe * jax.lax.rsqrt(jnp.sum(pe * pe, axis=-1, keepdims=True) + EPS)
    return emb_table[node_ids] + pe


def tree_embedding_forward(node_ids, basis3, emb_table, *, tile_rows=None,
                           min_pallas_tokens=1024):
    S, MD, D = basis3.shape
    V = emb_table.shape[0]
    lanes = 128

    packable = (D <= lanes) and (lanes % D == 0)
    G = lanes // D if packable else 0                     # tokens per packed row
    if (S < min_pallas_tokens) or (not packable) or (V > lanes // max(G, 1)):
        # TODO(synk): tiny S (launch overhead dominates) or shapes outside the
        # packed-layout assumptions use the fused XLA path.
        return tree_embedding_reference(node_ids, basis3, emb_table)
    Vpad = lanes // G                                     # == D here (>= V)

    R = -(-S // G)                                        # packed rows needed
    if tile_rows is None:
        # Large tiles (amortize ~0.35us/step), but >= 2 grid steps whenever R
        # allows so the "parallel" axis can use both TensorCores on v7x.
        tile_rows = min(1024, max(8, ((R + 15) // 16) * 8))
    R_pad = -(-R // tile_rows) * tile_rows
    S_pad = R_pad * G

    ids = jnp.pad(node_ids.astype(jnp.int32), (0, S_pad - S))
    b3 = jnp.pad(basis3.astype(jnp.float32), ((0, S_pad - S), (0, 0), (0, 0)))

    # ---- lane-dense packing: G tokens per 128-lane row (layout plumbing) ----
    ids_bcast = jnp.broadcast_to(ids.reshape(R_pad, G, 1),
                                 (R_pad, G, Vpad)).reshape(R_pad, lanes)
    basis_packed = jnp.transpose(b3.reshape(R_pad, G, MD, D),
                                 (0, 2, 1, 3)).reshape(R_pad, MD * lanes)

    # Block-diagonal embedding table (K padded to a lane-dense 128) and the
    # 0/1 group-sum matrix for the per-token L2 norm.  64 KiB each,
    # VMEM-resident (constant block index).
    emb_pad = jnp.zeros((Vpad, D), jnp.float32).at[:V, :].set(
        emb_table.astype(jnp.float32))
    table_bd = jnp.kron(jnp.eye(G, dtype=jnp.float32), emb_pad)             # (128, 128)
    group_sum = jnp.kron(jnp.eye(G, dtype=jnp.float32),
                         jnp.ones((D, D), jnp.float32))                     # (128, 128)

    kernel = functools.partial(tree_embedding_kernel,
                               max_depth=MD, vpad=Vpad, eps=EPS)
    out = pl.pallas_call(
        kernel,
        grid=(R_pad // tile_rows,),
        in_specs=[
            pl.BlockSpec((tile_rows, lanes), lambda i: (i, 0)),        # broadcast ids
            pl.BlockSpec((tile_rows, MD * lanes), lambda i: (i, 0)),   # packed basis
            pl.BlockSpec((lanes, lanes), lambda i: (0, 0)),            # block-diag table
            pl.BlockSpec((lanes, lanes), lambda i: (0, 0)),            # group-sum 0/1
        ],
        out_specs=pl.BlockSpec((tile_rows, lanes), lambda i: (i, 0)),
        out_shape=jax.ShapeDtypeStruct((R_pad, lanes), jnp.float32),
        compiler_params=pltpu.CompilerParams(
            dimension_semantics=("parallel",)),
    )(ids_bcast, basis_packed, table_bd, group_sum)

    return out.reshape(S_pad, D)[:S]


if __name__ == "__main__":
    key = jax.random.PRNGKey(0)
    k_emb, k_ids, k_paths = jax.random.split(key, 3)

    # deterministic parameters: nn.Embedding(vocab_size, embedding_dim) ~ N(0, 1)
    emb_table = jax.random.normal(k_emb, (VOCAB_SIZE, EMBED_DIM), dtype=jnp.float32)

    # --- small synthetic tree (8 nodes, max path depth 4), as in the module ---
    root = Node("module", [
        Node("func", [
            Node("name"),
            Node("if", [Node("call"), Node("const")]),
        ]),
        Node("for", [Node("binop")]),
    ])
    kind_list, position_list = breadth_traversal(root, MAX_NODE_SIZE)
    node_ids = jnp.asarray(kind_list, dtype=jnp.int32)              # (S,)
    paths, mask = pad_positions(position_list, MAX_DEPTH)           # (S, MAX_DEPTH)
    basis3 = make_position_basis(paths, mask, EMBED_DIM)            # (S, MD, D)

    # Force the Pallas path at tiny S to verify the kernel itself.
    out_small = tree_embedding_forward(node_ids, basis3, emb_table,
                                       min_pallas_tokens=0)
    out_small = jax.block_until_ready(out_small)
    ref_small = tree_embedding_reference(node_ids, basis3, emb_table)
    assert out_small.shape == (len(kind_list), EMBED_DIM)
    assert bool(jnp.all(jnp.isfinite(out_small)))
    assert jnp.allclose(out_small, ref_small, atol=1e-4, rtol=1e-4), \
        float(jnp.max(jnp.abs(out_small - ref_small)))

    # --- larger synthetic batch: exercises the multi-step parallel grid ---
    S_big = 10000
    ids_big = jax.random.randint(k_ids, (S_big,), 0, VOCAB_SIZE, dtype=jnp.int32)
    kd, kp = jax.random.split(k_paths)
    depth_big = jax.random.randint(kd, (S_big, 1), 1, MAX_DEPTH + 1)
    mask_big = (jnp.arange(MAX_DEPTH)[None, :] < depth_big).astype(jnp.int32)
    paths_big = jax.random.randint(kp, (S_big, MAX_DEPTH), 1, 12,
                                   dtype=jnp.int32) * mask_big
    basis_big = make_position_basis(paths_big, mask_big, EMBED_DIM)

    out_big = jax.block_until_ready(
        tree_embedding_forward(ids_big, basis_big, emb_table))
    ref_big = tree_embedding_reference(ids_big, basis_big, emb_table)
    assert out_big.shape == (S_big, EMBED_DIM)
    assert jnp.allclose(out_big, ref_big, atol=1e-4, rtol=1e-4), \
        float(jnp.max(jnp.abs(out_big - ref_big)))

    print("KERNEL_OK")
</pallas_src>

<mosaic_0001>
module attributes {stable_mosaic.version = 11 : i64} {
  func.func @tree_embedding_kernel(%arg0: i32, %arg1: memref<8x128xi32, #tpu.memory_space<vmem>>, %arg2: memref<8x512xf32, #tpu.memory_space<vmem>>, %arg3: memref<128x128xf32, #tpu.memory_space<vmem>>, %arg4: memref<128x128xf32, #tpu.memory_space<vmem>>, %arg5: memref<8x128xf32, #tpu.memory_space<vmem>>) attributes {dimension_semantics = [#tpu.dimension_semantics<parallel>], iteration_bounds = array<i64: 1>, scalar_prefetch = 0 : i64, scratch_operands = 0 : i64, tpu.core_type = #tpu.core_type<tc>, window_params = [{transform_indices = @transform_0, window_bounds = array<i64: 8, 128>}, {transform_indices = @transform_1, window_bounds = array<i64: 8, 512>}, {pipeline_mode = #tpu.pipeline_mode<synchronous>, transform_indices = @transform_2, window_bounds = array<i64: 128, 128>}, {pipeline_mode = #tpu.pipeline_mode<synchronous>, transform_indices = @transform_3, window_bounds = array<i64: 128, 128>}, {transform_indices = @transform_4, window_bounds = array<i64: 8, 128>}]} {
    %0 = tpu.iota {dimensions = array<i32: 1>} : vector<8x128xi32>
    %c0 = arith.constant 0 : index
    %c0_0 = arith.constant 0 : index
    %1 = vector.load %arg1[%c0, %c0_0] : memref<8x128xi32, #tpu.memory_space<vmem>>, vector<8x128xi32>
    %c32_i32 = arith.constant 32 : i32
    %c0_i32 = arith.constant 0 : i32
    %2 = arith.cmpi eq, %c32_i32, %c0_i32 : i32
    %c1_i32 = arith.constant 1 : i32
    %3 = arith.select %2, %c1_i32, %c32_i32 : i32
    %4 = vector.broadcast %3 : i32 to vector<8x128xi32>
    %5 = arith.remsi %0, %4 : vector<8x128xi32>
    %c0_i32_1 = arith.constant 0 : i32
    %6 = vector.broadcast %c0_i32_1 : i32 to vector<8x128xi32>
    %7 = arith.cmpi ne, %5, %6 : vector<8x128xi32>
    %c0_i32_2 = arith.constant 0 : i32
    %8 = vector.broadcast %c0_i32_2 : i32 to vector<8x128xi32>
    %9 = arith.cmpi slt, %5, %8 : vector<8x128xi32>
    %c0_i32_3 = arith.constant 0 : i32
    %10 = arith.cmpi slt, %3, %c0_i32_3 : i32
    %11 = vector.broadcast %10 : i1 to vector<8x128xi1>
    %12 = vector.broadcast %11 : vector<8x128xi1> to vector<8x128xi1>
    %13 = arith.xori %9, %12 : vector<8x128xi1>
    %14 = arith.andi %13, %7 : vector<8x128xi1>
    %15 = vector.broadcast %3 : i32 to vector<8x128xi32>
    %16 = arith.addi %5, %15 : vector<8x128xi32>
    %17 = arith.select %14, %16, %5 : vector<8x128xi1>, vector<8x128xi32>
    %18 = arith.cmpi eq, %1, %17 : vector<8x128xi32>
    %19 = arith.extui %18 : vector<8x128xi1> to vector<8x128xi32>
    %20 = arith.sitofp %19 : vector<8x128xi32> to vector<8x128xf32>
    %c0_4 = arith.constant 0 : index
    %c0_5 = arith.constant 0 : index
    %21 = vector.load %arg3[%c0_4, %c0_5] : memref<128x128xf32, #tpu.memory_space<vmem>>, vector<128x128xf32>
    %cst = arith.constant dense<0.000000e+00> : vector<8x128xf32>
    %22 = tpu.matmul %20, %21, %cst {dimension_numbers = #tpu.dot_dimension_numbers<[1], [0], [0], [1], [0, 0, 1, 1], [], []>} : vector<8x128xf32>, vector<128x128xf32>, vector<8x128xf32> -> vector<8x128xf32>
    %c0_6 = arith.constant 0 : index
    %c0_7 = arith.constant 0 : index
    %23 = vector.load %arg2[%c0_6, %c0_7] : memref<8x512xf32, #tpu.memory_space<vmem>>, vector<8x128xf32>
    %c0_8 = arith.constant 0 : index
    %c128 = arith.constant 128 : index
    %24 = vector.load %arg2[%c0_8, %c128] : memref<8x512xf32, #tpu.memory_space<vmem>>, vector<8x128xf32>
    %25 = arith.addf %23, %24 : vector<8x128xf32>
    %c0_9 = arith.constant 0 : index
    %c256 = arith.constant 256 : index
    %26 = vector.load %arg2[%c0_9, %c256] : memref<8x512xf32, #tpu.memory_space<vmem>>, vector<8x128xf32>
    %27 = arith.addf %25, %26 : vector<8x128xf32>
    %c0_10 = arith.constant 0 : index
    %c384 = arith.constant 384 : index
    %28 = vector.load %arg2[%c0_10, %c384] : memref<8x512xf32, #tpu.memory_space<vmem>>, vector<8x128xf32>
    %29 = arith.addf %27, %28 : vector<8x128xf32>
    %30 = arith.mulf %29, %29 : vector<8x128xf32>
    %c0_11 = arith.constant 0 : index
    %c0_12 = arith.constant 0 : index
    %31 = vector.load %arg4[%c0_11, %c0_12] : memref<128x128xf32, #tpu.memory_space<vmem>>, vector<128x128xf32>
    %cst_13 = arith.constant dense<0.000000e+00> : vector<8x128xf32>
    %32 = tpu.matmul %30, %31, %cst_13 {dimension_numbers = #tpu.dot_dimension_numbers<[1], [0], [0], [1], [0, 0, 1, 1], [], []>} : vector<8x128xf32>, vector<128x128xf32>, vector<8x128xf32> -> vector<8x128xf32>
    %cst_14 = arith.constant 9.99999997E-7 : f32
    %33 = vector.broadcast %cst_14 : f32 to vector<8x128xf32>
    %34 = arith.addf %32, %33 : vector<8x128xf32>
    %35 = math.rsqrt %34 : vector<8x128xf32>
    %36 = arith.mulf %29, %35 : vector<8x128xf32>
    %37 = arith.addf %22, %36 : vector<8x128xf32>
    %c0_15 = arith.constant 0 : index
    %c0_16 = arith.constant 0 : index
    %38 = vector.load %arg5[%c0_15, %c0_16] : memref<8x128xf32, #tpu.memory_space<vmem>>, vector<8x128xf32>
    tpu.vector_store %arg5[%c0_15, %c0_16], %37 {strides = array<i32>} : memref<8x128xf32, #tpu.memory_space<vmem>>, vector<8x128xf32>,
    return
  }
  func.func @transform_0(%arg0: i32) -> (i32, i32) {
    %c0_i32 = arith.constant 0 : i32
    %c0_i32_0 = arith.constant 0 : i32
    return %arg0, %c0_i32 : i32, i32
  }
  func.func @transform_1(%arg0: i32) -> (i32, i32) {
    %c0_i32 = arith.constant 0 : i32
    %c0_i32_0 = arith.constant 0 : i32
    return %arg0, %c0_i32 : i32, i32
  }
  func.func @transform_2(%arg0: i32) -> (i32, i32) {
    %c0_i32 = arith.constant 0 : i32
    %c0_i32_0 = arith.constant 0 : i32
    %c0_i32_1 = arith.constant 0 : i32
    return %c0_i32, %c0_i32_0 : i32, i32
  }
  func.func @transform_3(%arg0: i32) -> (i32, i32) {
    %c0_i32 = arith.constant 0 : i32
    %c0_i32_0 = arith.constant 0 : i32
    %c0_i32_1 = arith.constant 0 : i32
    return %c0_i32, %c0_i32_0 : i32, i32
  }
  func.func @transform_4(%arg0: i32) -> (i32, i32) {
    %c0_i32 = arith.constant 0 : i32
    %c0_i32_0 = arith.constant 0 : i32
    return %arg0, %c0_i32 : i32, i32
  }
}

</mosaic_0001>

<bundles_post_ra>
// kernel: tpu_custom_call.1
= control target key start
LH: loop header
LB: loop body
LE: loop exit
PB: predicated region body
PF: predicated region fallthrough
CT: control target
= control target key end

     0   :  { %9 = vsyncpa [#allocation3], 0  ;;  %s684_s0 = inlined_call_operand.hbm [shape: s32[8,128], index: 0, kind: input, shape index: {}]   ;;  %s685_s1 = inlined_call_operand.hbm [shape: f32[8,512], index: 1, kind: input, shape index: {}]   ;;  %s686_s2 = inlined_call_operand.hbm [shape: f32[128,128], index: 2, kind: input, shape index: {}]   ;;  %s687_s3 = inlined_call_operand.hbm [shape: f32[128,128], index: 3, kind: input, shape index: {}]   ;;  %s688_s4 = inlined_call_operand.hbm [shape: f32[8,128], index: 4, kind: output, shape index: {}]  }
   0x1   :  { %10 = vsyncpa [#allocation6], 0 }
   0x2   :  { %11 = vsyncpa [#allocation9], 0 }
   0x3   :  { %12 = vsyncpa [#allocation4], 0  ;;  %s572_s15 = smov [#allocation5]   ;;  %s573_s17 = smov [#allocation2]  }
   0x4   :  { %s29_s16 = sshll.u32 %s572_s15, 4  ;;  %s19_s18 = sshll.u32 %s573_s17, 4  ;;  %s30_s16 = int_to_ptr.vmem [resolvable:$true] %s29_s16  ;;  %s20_s18 = int_to_ptr.vmem [resolvable:$true] %s19_s18 }
   0x5   :  { %s454_s21 = scalar_lea.hbm %s685_s1, 512 }
   0x6   :  { %p455_p0 = scmp.ne.s32.totalorder %s685_s1, %s454_s21  ;;  %p458_p1 = scmp.lt.u32.totalorder %s454_s21, %s685_s1 }
   0x8   :  { %p460_p2 = pnand %p458_p1, %p455_p0 }
   0xa   :  { %463 = shalt.err (!%p460_p2)
}
   0xb   :  { %s464_s26 = scalar_lea.vmem %s30_s16, 512  ;;  %p469_p4 = scmp.lt.s32.totalorder %s30_s16, %s30_s16 }
   0xc   :  { %p465_p3 = scmp.ne.s32.totalorder %s30_s16, %s464_s26  ;;  %p470_p5 = scmp.lt.s32.totalorder %s464_s26, %s464_s26 }
   0xe   :  { %p471_p6 = por %p470_p5, %p469_p4 }
  0x10   :  { %p472_p7 = pnand %p471_p6, %p465_p3 }
  0x12   :  { %475 = shalt.err (!%p472_p7)
}
  0x13   :  { %32 = dma.hbm_to_vmem [thread:$0]  %s685_s1, 512, %s30_s16, [#allocation6]  }
  0x14   :  { %s476_s5 = scalar_lea.hbm %s684_s0, 128 }
  0x15   :  { %p477_p8 = scmp.ne.s32.totalorder %s684_s0, %s476_s5  ;;  %p480_p9 = scmp.lt.u32.totalorder %s476_s5, %s684_s0 }
  0x17   :  { %p482_p10 = pnand %p480_p9, %p477_p8 }
  0x19   :  { %485 = shalt.err (!%p482_p10)
}
  0x1a   :  { %s486_s10 = scalar_lea.vmem %s20_s18, 128  ;;  %p491_p12 = scmp.lt.s32.totalorder %s20_s18, %s20_s18 }
  0x1b   :  { %p487_p11 = scmp.ne.s32.totalorder %s20_s18, %s486_s10  ;;  %p492_p13 = scmp.lt.s32.totalorder %s486_s10, %s486_s10 }
  0x1d   :  { %p493_p0 = por %p492_p13, %p491_p12 }
  0x1f   :  { %p494_p1 = pnand %p493_p0, %p487_p11 }
  0x21   :  { %497 = shalt.err (!%p494_p1)
}
  0x22   :  { %22 = dma.hbm_to_vmem [thread:$0]  %s684_s0, 128, %s20_s18, [#allocation3]  }
  0x23   :  { %s574_s12 = smov [#allocation7]   ;;  %s498_s16 = scalar_lea.hbm %s686_s2, 2048 }
  0x24   :  { %s38_s13 = sshll.u32 %s574_s12, 4  ;;  %p499_p2 = scmp.ne.s32.totalorder %s686_s2, %s498_s16  ;;  %s39_s13 = int_to_ptr.vmem [resolvable:$true] %s38_s13 }
  0x25   :  { %p502_p3 = scmp.lt.u32.totalorder %s498_s16, %s686_s2 }
  0x27   :  { %p504_p4 = pnand %p502_p3, %p499_p2 }
  0x29   :  { %507 = shalt.err (!%p504_p4)
}
  0x2a   :  { %s508_s22 = scalar_lea.vmem %s39_s13, 2048  ;;  %p513_p6 = scmp.lt.s32.totalorder %s39_s13, %s39_s13 }
  0x2b   :  { %p509_p5 = scmp.ne.s32.totalorder %s39_s13, %s508_s22  ;;  %p514_p7 = scmp.lt.s32.totalorder %s508_s22, %s508_s22 }
  0x2d   :  { %p515_p8 = por %p514_p7, %p513_p6 }
  0x2f   :  { %p516_p9 = pnand %p515_p8, %p509_p5 }
  0x31   :  { %519 = shalt.err (!%p516_p9)
}
  0x32   :  { %s575_s0 = smov 128   ;;  %s576_s18 = smov 8  }
  0x33   :  { %44 = dma.hbm_to_vmem [thread:$0]  %s686_s2, 2048, %s39_s13, [#allocation6], %s575_s0, %s575_s0, %s576_s18  }
  0x34   :  { %s577_s25 = smov [#allocation8]   ;;  %s520_s29 = scalar_lea.hbm %s687_s3, 2048 }
  0x35   :  { %s50_s26 = sshll.u32 %s577_s25, 4  ;;  %p521_p10 = scmp.ne.s32.totalorder %s687_s3, %s520_s29  ;;  %s51_s26 = int_to_ptr.vmem [resolvable:$true] %s50_s26 }
  0x36   :  { %p524_p11 = scmp.lt.u32.totalorder %s520_s29, %s687_s3 }
  0x38   :  { %p526_p12 = pnand %p524_p11, %p521_p10 }
  0x3a   :  { %529 = shalt.err (!%p526_p12)
}
  0x3b   :  { %s530_s8 = scalar_lea.vmem %s51_s26, 2048  ;;  %p535_p0 = scmp.lt.s32.totalorder %s51_s26, %s51_s26 }
  0x3c   :  { %p531_p13 = scmp.ne.s32.totalorder %s51_s26, %s530_s8  ;;  %p536_p1 = scmp.lt.s32.totalorder %s530_s8, %s530_s8 }
  0x3e   :  { %p537_p2 = por %p536_p1, %p535_p0 }
  0x40   :  { %p538_p3 = pnand %p537_p2, %p531_p13 }
  0x42   :  { %541 = shalt.err (!%p538_p3)
}
  0x43   :  { %56 = dma.hbm_to_vmem [thread:$0]  %s687_s3, 2048, %s51_s26, [#allocation9], %s575_s0, %s575_s0, %s576_s18  }
  0x44   :  { %564 = dma.done.wait [#allocation3], 128  }
  0x45   :  { %565 = vsyncadd [#allocation3], 4294967168 }
  0x46   :  { %566 = dma.done.wait [#allocation6], 2560  }
  0x47   :  { %567 = vsyncadd [#allocation6], 4294964736 }
  0x48   :  { %568 = dma.done.wait [#allocation9], 2048  }
  0x49   :  { %569 = vsyncadd [#allocation9], 4294965248  ;;  %v578_v0 = vmov 0.0|0.0   ;;  %vm579_vm0 = vmmov 0   ;;  %v580_v1 = vmov 0.0   ;;  %v111_v2 = vld [vmem:[#allocation8] sm:$0xff]  ;;  %v69_v45 = vlaneseq }
  0x4a   :  { %393 = vmatprep.subr.bf16.mxu0 %v578_v0  ;;  %417 = vmatprep.subr.bf16.mxu1 %v578_v0  ;;  %v112_v3 = vld [vmem:[#allocation8 + $0x8] sm:$0xff]  ;;  %v113_v4 = vld [vmem:[#allocation8 + $0x10] sm:$0xff]  ;;  %v114_v6 = vld [vmem:[#allocation8 + $0x18] sm:$0xff]  ;;  %v581_v62 = vmov 1.0   ;;  %s582_s3 = smov [#allocation10]  }
  0x4b   :  { %355 = vmatprep.mubr.msk.f32.mxu0 %vm579_vm0, %v580_v1  ;;  %390 = vmatprep.mubr.msk.f32.mxu1 %vm579_vm0, %v580_v1  ;;  %v394_v5 = vpack.c.bf16 %v112_v3, %v111_v2  ;;  %v87_v7 = vld [vmem:[#allocation7] sm:$0xff]  ;;  %v397_v8 = vpack.c.bf16 %v114_v6, %v113_v4  ;;  %v88_v10 = vld [vmem:[#allocation7 + $0x8] sm:$0xff]  ;;  %v89_v13 = vld [vmem:[#allocation7 + $0x10] sm:$0xff]  ;;  %v70_v54 = vand.u32 127, %v69_v45  ;;  %s276_s10 = sshll.u32 %s582_s3, 4  ;;  %s277_s10 = int_to_ptr.vmem [resolvable:$true] %s276_s10 }
  0x4c   :  { %v115_v9 = vld [vmem:[#allocation8 + $0x20] sm:$0xff]  ;;  %v116_v11 = vld [vmem:[#allocation8 + $0x28] sm:$0xff]  ;;  %v418_v12 = vpack.c.bf16 %v88_v10, %v87_v7  ;;  %v90_v14 = vld [vmem:[#allocation7 + $0x18] sm:$0xff]  ;;  %s542_s1 = scalar_lea.vmem %s277_s10, 128  ;;  %p547_p5 = scmp.lt.s32.totalorder %s277_s10, %s277_s10 }
  0x4d   :  { %395 = vmatpush3.bf16.msra.mxu0 %v394_v5  ;;  %v421_v15 = vpack.c.bf16 %v90_v14, %v89_v13  ;;  %v400_v16 = vpack.c.bf16 %v116_v11, %v115_v9  ;;  %v91_v17 = vld [vmem:[#allocation7 + $0x20] sm:$0xff]  ;;  %v92_v18 = vld [vmem:[#allocation7 + $0x28] sm:$0xff]  ;;  %v117_v19 = vld [vmem:[#allocation8 + $0x30] sm:$0xff]  ;;  %v76_v60 = vand.u32 31, %v70_v54  ;;  %p543_p4 = scmp.ne.s32.totalorder %s277_s10, %s542_s1  ;;  %p548_p6 = scmp.lt.s32.totalorder %s542_s1, %s542_s1 }
  0x4e   :  { %396 = vmatprep.subr.bf16.mxu0 %v578_v0  ;;  %419 = vmatpush3.bf16.msra.mxu1 %v418_v12  ;;  %v118_v20 = vld [vmem:[#allocation8 + $0x38] sm:$0xff]  ;;  %v424_v21 = vpack.c.bf16 %v92_v18, %v91_v17  ;;  %v93_v23 = vld [vmem:[#allocation7 + $0x30] sm:$0xff]  ;;  %v119_v25 = vld [vmem:[#allocation8 + $0x40] sm:$0xff] }
  0x4f   :  { %420 = vmatprep.subr.bf16.mxu1 %v578_v0  ;;  %v403_v22 = vpack.c.bf16 %v118_v20, %v117_v19  ;;  %v94_v24 = vld [vmem:[#allocation7 + $0x38] sm:$0xff]  ;;  %v120_v26 = vld [vmem:[#allocation8 + $0x48] sm:$0xff]  ;;  %v95_v28 = vld [vmem:[#allocation7 + $0x40] sm:$0xff]  ;;  %p549_p7 = por %p548_p6, %p547_p5 }
  0x50   :  { %v427_v27 = vpack.c.bf16 %v94_v24, %v93_v23  ;;  %v406_v29 = vpack.c.bf16 %v120_v26, %v119_v25  ;;  %v96_v30 = vld [vmem:[#allocation7 + $0x48] sm:$0xff]  ;;  %v103_v31 = vld [vmem:[#allocation5] sm:$0xff]  ;;  %v121_v33 = vld [vmem:[#allocation8 + $0x50] sm:$0xff] }
  0x51   :  { %398 = vmatpush3.bf16.msra.mxu0 %v397_v8  ;;  %v104_v32 = vld [vmem:[#allocation5 + $0x8] sm:$0xff]  ;;  %v122_v34 = vld [vmem:[#allocation8 + $0x58] sm:$0xff]  ;;  %v430_v35 = vpack.c.bf16 %v96_v30, %v95_v28  ;;  %v106_v38 = vld [vmem:[#allocation5 + $0x10] sm:$0xff]  ;;  %p550_p8 = pnand %p549_p7, %p543_p4 }
  0x52   :  { %399 = vmatprep.subr.bf16.mxu0 %v578_v0  ;;  %422 = vmatpush3.bf16.msra.mxu1 %v421_v15  ;;  %v105_v36 = vadd.f32 %v104_v32, %v103_v31  ;;  %v409_v37 = vpack.c.bf16 %v122_v34, %v121_v33  ;;  %v97_v39 = vld [vmem:[#allocation7 + $0x50] sm:$0xff]  ;;  %v98_v40 = vld [vmem:[#allocation7 + $0x58] sm:$0xff]  ;;  %v123_v41 = vld [vmem:[#allocation8 + $0x60] sm:$0xff] }
  0x53   :  { %423 = vmatprep.subr.bf16.mxu1 %v578_v0  ;;  %v124_v42 = vld [vmem:[#allocation8 + $0x68] sm:$0xff]  ;;  %v433_v44 = vpack.c.bf16 %v98_v40, %v97_v39  ;;  %v108_v47 = vld [vmem:[#allocation5 + $0x18] sm:$0xff]  ;;  %v99_v48 = vld [vmem:[#allocation7 + $0x60] sm:$0xff] }
  0x54   :  { %v107_v43 = vadd.f32 %v106_v38, %v105_v36  ;;  %v412_v46 = vpack.c.bf16 %v124_v42, %v123_v41  ;;  %v100_v49 = vld [vmem:[#allocation7 + $0x68] sm:$0xff]  ;;  %v125_v50 = vld [vmem:[#allocation8 + $0x70] sm:$0xff]  ;;  %v126_v51 = vld [vmem:[#allocation8 + $0x78] sm:$0xff] }
  0x55   :  { %401 = vmatpush3.bf16.msra.mxu0 %v400_v16  ;;  %v436_v53 = vpack.c.bf16 %v100_v49, %v99_v48  ;;  %v415_v55 = vpack.c.bf16 %v126_v51, %v125_v50  ;;  %v101_v56 = vld [vmem:[#allocation7 + $0x70] sm:$0xff]  ;;  %v102_v57 = vld [vmem:[#allocation7 + $0x78] sm:$0xff] }
  0x56   :  { %402 = vmatprep.subr.bf16.mxu0 %v578_v0  ;;  %425 = vmatpush3.bf16.msra.mxu1 %v424_v21  ;;  %v109_v52 = vadd.f32 %v108_v47, %v107_v43  ;;  %v439_v59 = vpack.c.bf16 %v102_v57, %v101_v56  ;;  %v71_v61 = vld [vmem:[#allocation2] sm:$0xff] }
  0x57   :  { %426 = vmatprep.subr.bf16.mxu1 %v578_v0  ;;  %vm84_vm1 = vcmp.eq.s32.totalorder %v71_v61, %v76_v60 }
  0x58   :  { %v110_v58 = vmul.f32 %v109_v52, %v109_v52 }
  0x59   :  { %404 = vmatpush3.bf16.msra.mxu0 %v403_v22 }
  0x5a   :  { %405 = vmatprep.subr.bf16.mxu0 %v578_v0  ;;  %428 = vmatpush3.bf16.msra.mxu1 %v427_v27 }
  0x5b   :  { %429 = vmatprep.subr.bf16.mxu1 %v578_v0 }
  0x5d   :  { %407 = vmatpush3.bf16.msra.mxu0 %v406_v29 }
  0x5e   :  { %408 = vmatprep.subr.bf16.mxu0 %v578_v0  ;;  %431 = vmatpush3.bf16.msra.mxu1 %v430_v35 }
  0x5f   :  { %432 = vmatprep.subr.bf16.mxu1 %v578_v0 }
  0x61   :  { %410 = vmatpush3.bf16.msra.mxu0 %v409_v37 }
  0x62   :  { %411 = vmatprep.subr.bf16.mxu0 %v578_v0  ;;  %434 = vmatpush3.bf16.msra.mxu1 %v433_v44 }
  0x63   :  { %435 = vmatprep.subr.bf16.mxu1 %v578_v0 }
  0x65   :  { %413 = vmatpush3.bf16.msra.mxu0 %v412_v46 }
  0x66   :  { %414 = vmatprep.subr.bf16.mxu0 %v578_v0  ;;  %437 = vmatpush3.bf16.msra.mxu1 %v436_v53 }
  0x67   :  { %438 = vmatprep.subr.bf16.mxu1 %v578_v0 }
  0x69   :  { %416 = vmatpush3.bf16.msra.mxu0 %v415_v55 }
  0x6a   :  { %440 = vmatpush3.bf16.msra.mxu1 %v439_v59 }
  0x6c   :  { %356 = vmatmul.mubr.f32.vlgmr.msra.gmra.mrb[0].mxu0 %v110_v58 }
  0x6d   :  { %391 = vmatmul.mubr.msk.f32.vlgmr.msra.gmra.mrb[0].mxu1 %vm84_vm1, %v581_v62 }
 0x13f   :  { %v193_v63 = vpop.f32.mrb[0].mxu0 }
 0x140   :  { %v194_v1 = vadd.f32 1e-06, %v193_v63  ;;  %v357_v2 = vpop.f32.mrb[1].mxu0  ;;  %v265_v3 = vpop.f32.mrb[0].mxu1 }
 0x141   :  { %v392_v4 = vpop.f32.mrb[1].mxu1 }
 0x142   :  { %452 = vrsqrt.f32 %v194_v1 }
 0x14c   :  { %v453_v5 = vpop.eup %452 }
 0x14d   :  { %v198_v6 = vmul.f32 %v453_v5, %v109_v52 }
 0x14f   :  { %v266_v7 = vadd.f32 %v265_v3, %v198_v6 }
 0x151   :  { %269 = vst [vmem:[#allocation10] sm:$0xff] %v266_v7 }
 0x152   :  { %553 = shalt.err (!%p550_p8)
}
 0x153   :  { %s554_s13 = scalar_lea.hbm %s688_s4, 128 }
 0x154   :  { %p555_p9 = scmp.ne.s32.totalorder %s688_s4, %s554_s13  ;;  %p558_p10 = scmp.lt.u32.totalorder %s554_s13, %s688_s4 }
 0x156   :  { %p560_p11 = pnand %p558_p10, %p555_p9 }
 0x158   :  { %563 = shalt.err (!%p560_p11)
}
 0x159   :  { %279 = dma.vmem_to_hbm [thread:$0]  %s277_s10, 128, %s688_s4, [#allocation4]  }
 0x15a   :  { %570 = dma.done.wait [#allocation4], 128  }
 0x15b   :  { %571 = vsyncadd [#allocation4], 4294967168 }
 0x15c   :  { %283 = vsyncpa [#allocation3], 1 }
 0x15d   :  { %284 = vsyncpa [#allocation6], 1 }
 0x15e   :  { %285 = vsyncpa [#allocation9], 1 }
 0x15f   :  { %286 = vsyncpa [#allocation4], 1 }

</bundles_post_ra>
